<compile_context>
chip_gen: v7x
topology: tpu7x:2x2x1
jax: 0.10.0
libtpu: 0.0.40
codegen_flags: <defaults>
</compile_context>

<pallas_src>
import numpy as np
import jax
import jax.numpy as jnp
from jax.experimental import pallas as pl
from jax.experimental.pallas import tpu as pltpu

REP_DIM = 128      # stands in for distilbert's 768 sentence-embedding dim
HIDDEN_DIM = 256   # stands in for the module's 8192 hidden dim (small shapes)
BN_EPS = 1e-5      # torch.nn.BatchNorm1d default eps
NORM_EPS = 1e-12   # torch.nn.functional.normalize default eps
GAMMA = 0.99       # EMA coefficient for the target encoder


# ---------------------------------------------------------------------------
# Pallas kernel: predictor MLP + normalize + positives/negatives reductions
# ---------------------------------------------------------------------------
def _l2norm(x):
    # torch.nn.functional.normalize(x, dim=-1): x / max(||x||_2, eps)
    # == x * rsqrt(max(||x||^2, eps^2))  (rsqrt lowers to the EUP slot).
    ss = jnp.sum(x * x, axis=-1, keepdims=True)
    return x * jax.lax.rsqrt(jnp.maximum(ss, NORM_EPS * NORM_EPS))


def _bn_relu(z, gamma, beta):
    # Training-mode BatchNorm1d (batch stats, biased variance) + ReLU, with
    # single-pass statistics and the per-feature affine folded into one FMA.
    # The Linear bias that precedes BN cancels exactly under batch-mean
    # subtraction, so it is folded out upstream of this call.
    inv_b = 1.0 / z.shape[0]
    s1 = jnp.sum(z, axis=0, keepdims=True)
    s2 = jnp.sum(z * z, axis=0, keepdims=True)
    mean = s1 * inv_b
    var = s2 * inv_b - mean * mean
    scale = gamma * jax.lax.rsqrt(var + BN_EPS)
    shift = beta - mean * scale
    return jnp.maximum(z * scale + shift, 0.0)


def byol_kernel(ex_ref, ey_ref, w1_ref, w23_ref, w4_ref, bn_ref, b4_ref,
                pos_ref, neg_ref):
    ex = ex_ref[...].astype(jnp.float32)   # (B, REP_DIM)  online sentence emb
    ey = ey_ref[...].astype(jnp.float32)   # (B, REP_DIM)  target sentence emb

    # --- target path first (independent of the MLP; its rsqrt / reductions can
    # be scheduled under the MXU matmuls below) ------------------------------
    y_emb = _l2norm(ey)                                    # (B, REP_DIM)
    y_sum = jnp.sum(y_emb, axis=0, keepdims=True)          # (1, REP_DIM)

    # --- online path: predictor(normalize(encoder(x))) ----------------------
    nx = _l2norm(ex)
    h = jnp.dot(nx.astype(jnp.bfloat16), w1_ref[...],
                preferred_element_type=jnp.float32)
    h = _bn_relu(h, bn_ref[0:1, :], bn_ref[1:2, :])
    h = jnp.dot(h.astype(jnp.bfloat16), w23_ref[0],
                preferred_element_type=jnp.float32)
    h = _bn_relu(h, bn_ref[2:3, :], bn_ref[3:4, :])
    h = jnp.dot(h.astype(jnp.bfloat16), w23_ref[1],
                preferred_element_type=jnp.float32)
    h = _bn_relu(h, bn_ref[4:5, :], bn_ref[5:6, :])
    p = jnp.dot(h.astype(jnp.bfloat16), w4_ref[...],
                preferred_element_type=jnp.float32) + b4_ref[...]

    x_emb = _l2norm(p)                                     # (B, REP_DIM)

    # --- scores reductions, without materializing the (B,B) score matrix ----
    # positives = sum_i <x_i, y_i> ; total = <sum_i x_i, sum_j y_j>
    b = x_emb.shape[0]
    pos = jnp.sum(x_emb * y_emb)
    tot = jnp.sum(jnp.sum(x_emb, axis=0, keepdims=True) * y_sum)
    neg = tot - pos

    pos_ref[0, 0] = pos / b
    neg_ref[0, 0] = neg / ((b - 1) * b)


def byol_head(ex, ey, params):
    """Run the fused predictor + scoring kernel. ex/ey: (B, REP_DIM) f32."""
    vmem = pl.BlockSpec(memory_space=pltpu.MemorySpace.VMEM)
    smem = pl.BlockSpec(memory_space=pltpu.MemorySpace.SMEM)
    inputs = (
        ex, ey,
        params["w1t"],      # (REP_DIM, HIDDEN)        bf16
        params["w23t"],     # (2, HIDDEN, HIDDEN)      bf16 (w2, w3 stacked)
        params["w4t"],      # (HIDDEN, REP_DIM)        bf16
        params["bn_pack"],  # (6, HIDDEN)              f32: g1,be1,g2,be2,g3,be3
        params["b4"],       # (1, REP_DIM)             f32
    )
    pos, neg = pl.pallas_call(
        byol_kernel,
        out_shape=(jax.ShapeDtypeStruct((1, 1), jnp.float32),
                   jax.ShapeDtypeStruct((1, 1), jnp.float32)),
        in_specs=[vmem] * len(inputs),
        out_specs=(smem, smem),
    )(*inputs)
    return pos[0, 0], neg[0, 0]


# ---------------------------------------------------------------------------
# Encoder stand-in + parameter setup (plain JAX glue)
# ---------------------------------------------------------------------------
# TODO(synk): the pretrained 'msmarco-distilbert-base-v3' transformer stack has
# no Pallas equivalent here; it is replaced by a deterministic token-embedding
# lookup + attention-mask mean pooling producing (B, REP_DIM) sentence embeds.
def encode(emb_table, input_ids, attention_mask):
    tok = jnp.take(emb_table, input_ids, axis=0)              # (B, S, D)
    mask = attention_mask[..., None].astype(jnp.float32)       # (B, S, 1)
    summed = jnp.sum(tok * mask, axis=1)                        # (B, D)
    counts = jnp.clip(jnp.sum(mask, axis=1), 1e-9, None)        # (B, 1)
    return summed / counts


def init_params(key, vocab):
    ks = jax.random.split(key, 5)
    scale = 0.02
    w1 = scale * jax.random.normal(ks[1], (REP_DIM, HIDDEN_DIM), jnp.float32)
    w2 = scale * jax.random.normal(ks[2], (HIDDEN_DIM, HIDDEN_DIM), jnp.float32)
    w3 = scale * jax.random.normal(ks[3], (HIDDEN_DIM, HIDDEN_DIM), jnp.float32)
    w4 = scale * jax.random.normal(ks[4], (HIDDEN_DIM, REP_DIM), jnp.float32)
    # BatchNorm affine params packed into one array: rows = g1,be1,g2,be2,g3,be3.
    # (The Linear biases b1..b3 before training-mode BatchNorm cancel exactly
    #  and are therefore folded out of the kernel.)
    bn_pack = jnp.concatenate([
        jnp.ones((1, HIDDEN_DIM), jnp.float32),   # g1
        jnp.zeros((1, HIDDEN_DIM), jnp.float32),  # be1
        jnp.ones((1, HIDDEN_DIM), jnp.float32),   # g2
        jnp.zeros((1, HIDDEN_DIM), jnp.float32),  # be2
        jnp.ones((1, HIDDEN_DIM), jnp.float32),   # g3
        jnp.zeros((1, HIDDEN_DIM), jnp.float32),  # be3
    ], axis=0)
    params = {
        "emb_online": jax.random.normal(ks[0], (vocab, REP_DIM), jnp.float32),
        "w1t": w1.astype(jnp.bfloat16),
        "w23t": jnp.stack([w2, w3], axis=0).astype(jnp.bfloat16),
        "w4t": w4.astype(jnp.bfloat16),
        "b4": jnp.zeros((1, REP_DIM), jnp.float32),
        "bn_pack": bn_pack,
    }
    # target encoder = deepcopy of online encoder (requires_grad_(False))
    params["emb_target"] = params["emb_online"]
    return params


def bert_model_forward(params, x, y, gamma=GAMMA, rng=None):
    """Reproduces BERTModel.forward semantics with the simplified encoder."""
    flip = int(rng.binomial(1, 0.5)) if rng is not None else 0
    if flip == 0:
        ex = encode(params["emb_online"], x["input_ids"], x["attention_mask"])
        ey = encode(params["emb_target"], y["input_ids"], y["attention_mask"])
    else:
        ex = encode(params["emb_online"], y["input_ids"], y["attention_mask"])
        ey = encode(params["emb_target"], x["input_ids"], x["attention_mask"])
    ey = jax.lax.stop_gradient(ey)   # .clone().detach()

    positives, negatives = byol_head(ex, ey, params)

    # update_target(): EMA of encoder weights into the target encoder
    new_target = params["emb_target"] * gamma + params["emb_online"] * (1.0 - gamma)
    new_params = dict(params, emb_target=new_target)
    return (positives, negatives, -positives), new_params


if __name__ == "__main__":
    B, SEQ, VOCAB = 8, 8, 64
    key = jax.random.PRNGKey(0)
    pkey, xkey, ykey = jax.random.split(key, 3)

    params = init_params(pkey, VOCAB)

    x = {
        "input_ids": jax.random.randint(xkey, (B, SEQ), 0, VOCAB, jnp.int32),
        "attention_mask": jnp.ones((B, SEQ), jnp.int32),
    }
    y = {
        "input_ids": jax.random.randint(ykey, (B, SEQ), 0, VOCAB, jnp.int32),
        "attention_mask": jnp.ones((B, SEQ), jnp.int32),
    }

    rng = np.random.default_rng(0)   # deterministic stand-in for np.random.binomial
    (positives, negatives, neg_loss), new_params = bert_model_forward(
        params, x, y, gamma=GAMMA, rng=rng)

    jax.block_until_ready((positives, negatives, neg_loss,
                           new_params["emb_target"]))
    print("KERNEL_OK")
</pallas_src>

<mosaic_0001>
module attributes {stable_mosaic.version = 11 : i64} {
  func.func @byol_kernel(%arg0: memref<8x128xf32, #tpu.memory_space<vmem>>, %arg1: memref<8x128xf32, #tpu.memory_space<vmem>>, %arg2: memref<128x256xbf16, #tpu.memory_space<vmem>>, %arg3: memref<2x256x256xbf16, #tpu.memory_space<vmem>>, %arg4: memref<256x128xbf16, #tpu.memory_space<vmem>>, %arg5: memref<6x256xf32, #tpu.memory_space<vmem>>, %arg6: memref<1x128xf32, #tpu.memory_space<vmem>>, %arg7: memref<1x1xf32, #tpu.memory_space<smem>>, %arg8: memref<1x1xf32, #tpu.memory_space<smem>>) attributes {dimension_semantics = [], scalar_prefetch = 0 : i64, scratch_operands = 0 : i64, tpu.core_type = #tpu.core_type<tc>} {
    %c0 = arith.constant 0 : index
    %c0_0 = arith.constant 0 : index
    %0 = vector.load %arg0[%c0, %c0_0] : memref<8x128xf32, #tpu.memory_space<vmem>>, vector<8x128xf32>
    %c0_1 = arith.constant 0 : index
    %c0_2 = arith.constant 0 : index
    %1 = vector.load %arg1[%c0_1, %c0_2] : memref<8x128xf32, #tpu.memory_space<vmem>>, vector<8x128xf32>
    %2 = arith.mulf %1, %1 : vector<8x128xf32>
    %cst = arith.constant dense<0.000000e+00> : vector<8xf32>
    %3 = vector.multi_reduction <add>, %2, %cst [1] : vector<8x128xf32> to vector<8xf32>
    %4 = vector.shape_cast %3 : vector<8xf32> to vector<8x1xf32>
    %cst_3 = arith.constant 1.000000e-24 : f32
    %5 = vector.broadcast %cst_3 : f32 to vector<8x1xf32>
    %6 = arith.maximumf %4, %5 : vector<8x1xf32>
    %7 = math.rsqrt %6 : vector<8x1xf32>
    %8 = vector.broadcast %7 : vector<8x1xf32> to vector<8x128xf32>
    %9 = arith.mulf %1, %8 : vector<8x128xf32>
    %cst_4 = arith.constant dense<0.000000e+00> : vector<128xf32>
    %10 = vector.multi_reduction <add>, %9, %cst_4 [0] : vector<8x128xf32> to vector<128xf32>
    %11 = vector.shape_cast %10 : vector<128xf32> to vector<1x128xf32>
    %12 = arith.mulf %0, %0 : vector<8x128xf32>
    %cst_5 = arith.constant dense<0.000000e+00> : vector<8xf32>
    %13 = vector.multi_reduction <add>, %12, %cst_5 [1] : vector<8x128xf32> to vector<8xf32>
    %14 = vector.shape_cast %13 : vector<8xf32> to vector<8x1xf32>
    %cst_6 = arith.constant 1.000000e-24 : f32
    %15 = vector.broadcast %cst_6 : f32 to vector<8x1xf32>
    %16 = arith.maximumf %14, %15 : vector<8x1xf32>
    %17 = math.rsqrt %16 : vector<8x1xf32>
    %18 = vector.broadcast %17 : vector<8x1xf32> to vector<8x128xf32>
    %19 = arith.mulf %0, %18 : vector<8x128xf32>
    %20 = arith.truncf %19 : vector<8x128xf32> to vector<8x128xbf16>
    %c0_7 = arith.constant 0 : index
    %c0_8 = arith.constant 0 : index
    %21 = vector.load %arg2[%c0_7, %c0_8] : memref<128x256xbf16, #tpu.memory_space<vmem>>, vector<128x256xbf16>
    %cst_9 = arith.constant dense<0.000000e+00> : vector<8x256xf32>
    %22 = tpu.matmul %20, %21, %cst_9 {dimension_numbers = #tpu.dot_dimension_numbers<[1], [0], [0], [1], [0, 0, 1, 1], [], []>} : vector<8x128xbf16>, vector<128x256xbf16>, vector<8x256xf32> -> vector<8x256xf32>
    %c0_10 = arith.constant 0 : index
    %c0_11 = arith.constant 0 : index
    %23 = vector.load %arg5[%c0_10, %c0_11] : memref<6x256xf32, #tpu.memory_space<vmem>>, vector<1x256xf32>
    %c1 = arith.constant 1 : index
    %c0_12 = arith.constant 0 : index
    %24 = vector.load %arg5[%c1, %c0_12] : memref<6x256xf32, #tpu.memory_space<vmem>>, vector<1x256xf32>
    %cst_13 = arith.constant dense<0.000000e+00> : vector<256xf32>
    %25 = vector.multi_reduction <add>, %22, %cst_13 [0] : vector<8x256xf32> to vector<256xf32>
    %26 = vector.shape_cast %25 : vector<256xf32> to vector<1x256xf32>
    %27 = arith.mulf %22, %22 : vector<8x256xf32>
    %cst_14 = arith.constant dense<0.000000e+00> : vector<256xf32>
    %28 = vector.multi_reduction <add>, %27, %cst_14 [0] : vector<8x256xf32> to vector<256xf32>
    %29 = vector.shape_cast %28 : vector<256xf32> to vector<1x256xf32>
    %cst_15 = arith.constant 1.250000e-01 : f32
    %30 = vector.broadcast %cst_15 : f32 to vector<1x256xf32>
    %31 = arith.mulf %26, %30 : vector<1x256xf32>
    %cst_16 = arith.constant 1.250000e-01 : f32
    %32 = vector.broadcast %cst_16 : f32 to vector<1x256xf32>
    %33 = arith.mulf %29, %32 : vector<1x256xf32>
    %34 = arith.mulf %31, %31 : vector<1x256xf32>
    %35 = arith.subf %33, %34 : vector<1x256xf32>
    %cst_17 = arith.constant 9.99999974E-6 : f32
    %36 = vector.broadcast %cst_17 : f32 to vector<1x256xf32>
    %37 = arith.addf %35, %36 : vector<1x256xf32>
    %38 = math.rsqrt %37 : vector<1x256xf32>
    %39 = arith.mulf %23, %38 : vector<1x256xf32>
    %40 = arith.mulf %31, %39 : vector<1x256xf32>
    %41 = arith.subf %24, %40 : vector<1x256xf32>
    %42 = vector.broadcast %39 : vector<1x256xf32> to vector<8x256xf32>
    %43 = arith.mulf %22, %42 : vector<8x256xf32>
    %44 = vector.broadcast %41 : vector<1x256xf32> to vector<8x256xf32>
    %45 = arith.addf %43, %44 : vector<8x256xf32>
    %cst_18 = arith.constant 0.000000e+00 : f32
    %46 = vector.broadcast %cst_18 : f32 to vector<8x256xf32>
    %47 = arith.maximumf %45, %46 : vector<8x256xf32>
    %48 = arith.truncf %47 : vector<8x256xf32> to vector<8x256xbf16>
    %c0_19 = arith.constant 0 : index
    %c0_20 = arith.constant 0 : index
    %c0_21 = arith.constant 0 : index
    %49 = vector.load %arg3[%c0_19, %c0_20, %c0_21] : memref<2x256x256xbf16, #tpu.memory_space<vmem>>, vector<1x256x256xbf16>
    %50 = vector.shape_cast %49 : vector<1x256x256xbf16> to vector<256x256xbf16>
    %cst_22 = arith.constant dense<0.000000e+00> : vector<8x256xf32>
    %51 = tpu.matmul %48, %50, %cst_22 {dimension_numbers = #tpu.dot_dimension_numbers<[1], [0], [0], [1], [0, 0, 1, 1], [], []>} : vector<8x256xbf16>, vector<256x256xbf16>, vector<8x256xf32> -> vector<8x256xf32>
    %c2 = arith.constant 2 : index
    %c0_23 = arith.constant 0 : index
    %52 = vector.load %arg5[%c2, %c0_23] : memref<6x256xf32, #tpu.memory_space<vmem>>, vector<1x256xf32>
    %c3 = arith.constant 3 : index
    %c0_24 = arith.constant 0 : index
    %53 = vector.load %arg5[%c3, %c0_24] : memref<6x256xf32, #tpu.memory_space<vmem>>, vector<1x256xf32>
    %cst_25 = arith.constant dense<0.000000e+00> : vector<256xf32>
    %54 = vector.multi_reduction <add>, %51, %cst_25 [0] : vector<8x256xf32> to vector<256xf32>
    %55 = vector.shape_cast %54 : vector<256xf32> to vector<1x256xf32>
    %56 = arith.mulf %51, %51 : vector<8x256xf32>
    %cst_26 = arith.constant dense<0.000000e+00> : vector<256xf32>
    %57 = vector.multi_reduction <add>, %56, %cst_26 [0] : vector<8x256xf32> to vector<256xf32>
    %58 = vector.shape_cast %57 : vector<256xf32> to vector<1x256xf32>
    %cst_27 = arith.constant 1.250000e-01 : f32
    %59 = vector.broadcast %cst_27 : f32 to vector<1x256xf32>
    %60 = arith.mulf %55, %59 : vector<1x256xf32>
    %cst_28 = arith.constant 1.250000e-01 : f32
    %61 = vector.broadcast %cst_28 : f32 to vector<1x256xf32>
    %62 = arith.mulf %58, %61 : vector<1x256xf32>
    %63 = arith.mulf %60, %60 : vector<1x256xf32>
    %64 = arith.subf %62, %63 : vector<1x256xf32>
    %cst_29 = arith.constant 9.99999974E-6 : f32
    %65 = vector.broadcast %cst_29 : f32 to vector<1x256xf32>
    %66 = arith.addf %64, %65 : vector<1x256xf32>
    %67 = math.rsqrt %66 : vector<1x256xf32>
    %68 = arith.mulf %52, %67 : vector<1x256xf32>
    %69 = arith.mulf %60, %68 : vector<1x256xf32>
    %70 = arith.subf %53, %69 : vector<1x256xf32>
    %71 = vector.broadcast %68 : vector<1x256xf32> to vector<8x256xf32>
    %72 = arith.mulf %51, %71 : vector<8x256xf32>
    %73 = vector.broadcast %70 : vector<1x256xf32> to vector<8x256xf32>
    %74 = arith.addf %72, %73 : vector<8x256xf32>
    %cst_30 = arith.constant 0.000000e+00 : f32
    %75 = vector.broadcast %cst_30 : f32 to vector<8x256xf32>
    %76 = arith.maximumf %74, %75 : vector<8x256xf32>
    %77 = arith.truncf %76 : vector<8x256xf32> to vector<8x256xbf16>
    %c1_31 = arith.constant 1 : index
    %c0_32 = arith.constant 0 : index
    %c0_33 = arith.constant 0 : index
    %78 = vector.load %arg3[%c1_31, %c0_32, %c0_33] : memref<2x256x256xbf16, #tpu.memory_space<vmem>>, vector<1x256x256xbf16>
    %79 = vector.shape_cast %78 : vector<1x256x256xbf16> to vector<256x256xbf16>
    %cst_34 = arith.constant dense<0.000000e+00> : vector<8x256xf32>
    %80 = tpu.matmul %77, %79, %cst_34 {dimension_numbers = #tpu.dot_dimension_numbers<[1], [0], [0], [1], [0, 0, 1, 1], [], []>} : vector<8x256xbf16>, vector<256x256xbf16>, vector<8x256xf32> -> vector<8x256xf32>
    %c4 = arith.constant 4 : index
    %c0_35 = arith.constant 0 : index
    %81 = vector.load %arg5[%c4, %c0_35] : memref<6x256xf32, #tpu.memory_space<vmem>>, vector<1x256xf32>
    %c5 = arith.constant 5 : index
    %c0_36 = arith.constant 0 : index
    %82 = vector.load %arg5[%c5, %c0_36] : memref<6x256xf32, #tpu.memory_space<vmem>>, vector<1x256xf32>
    %cst_37 = arith.constant dense<0.000000e+00> : vector<256xf32>
    %83 = vector.multi_reduction <add>, %80, %cst_37 [0] : vector<8x256xf32> to vector<256xf32>
    %84 = vector.shape_cast %83 : vector<256xf32> to vector<1x256xf32>
    %85 = arith.mulf %80, %80 : vector<8x256xf32>
    %cst_38 = arith.constant dense<0.000000e+00> : vector<256xf32>
    %86 = vector.multi_reduction <add>, %85, %cst_38 [0] : vector<8x256xf32> to vector<256xf32>
    %87 = vector.shape_cast %86 : vector<256xf32> to vector<1x256xf32>
    %cst_39 = arith.constant 1.250000e-01 : f32
    %88 = vector.broadcast %cst_39 : f32 to vector<1x256xf32>
    %89 = arith.mulf %84, %88 : vector<1x256xf32>
    %cst_40 = arith.constant 1.250000e-01 : f32
    %90 = vector.broadcast %cst_40 : f32 to vector<1x256xf32>
    %91 = arith.mulf %87, %90 : vector<1x256xf32>
    %92 = arith.mulf %89, %89 : vector<1x256xf32>
    %93 = arith.subf %91, %92 : vector<1x256xf32>
    %cst_41 = arith.constant 9.99999974E-6 : f32
    %94 = vector.broadcast %cst_41 : f32 to vector<1x256xf32>
    %95 = arith.addf %93, %94 : vector<1x256xf32>
    %96 = math.rsqrt %95 : vector<1x256xf32>
    %97 = arith.mulf %81, %96 : vector<1x256xf32>
    %98 = arith.mulf %89, %97 : vector<1x256xf32>
    %99 = arith.subf %82, %98 : vector<1x256xf32>
    %100 = vector.broadcast %97 : vector<1x256xf32> to vector<8x256xf32>
    %101 = arith.mulf %80, %100 : vector<8x256xf32>
    %102 = vector.broadcast %99 : vector<1x256xf32> to vector<8x256xf32>
    %103 = arith.addf %101, %102 : vector<8x256xf32>
    %cst_42 = arith.constant 0.000000e+00 : f32
    %104 = vector.broadcast %cst_42 : f32 to vector<8x256xf32>
    %105 = arith.maximumf %103, %104 : vector<8x256xf32>
    %106 = arith.truncf %105 : vector<8x256xf32> to vector<8x256xbf16>
    %c0_43 = arith.constant 0 : index
    %c0_44 = arith.constant 0 : index
    %107 = vector.load %arg4[%c0_43, %c0_44] : memref<256x128xbf16, #tpu.memory_space<vmem>>, vector<256x128xbf16>
    %cst_45 = arith.constant dense<0.000000e+00> : vector<8x128xf32>
    %108 = tpu.matmul %106, %107, %cst_45 {dimension_numbers = #tpu.dot_dimension_numbers<[1], [0], [0], [1], [0, 0, 1, 1], [], []>} : vector<8x256xbf16>, vector<256x128xbf16>, vector<8x128xf32> -> vector<8x128xf32>
    %c0_46 = arith.constant 0 : index
    %c0_47 = arith.constant 0 : index
    %109 = vector.load %arg6[%c0_46, %c0_47] : memref<1x128xf32, #tpu.memory_space<vmem>>, vector<1x128xf32>
    %110 = vector.broadcast %109 : vector<1x128xf32> to vector<8x128xf32>
    %111 = arith.addf %108, %110 : vector<8x128xf32>
    %112 = arith.mulf %111, %111 : vector<8x128xf32>
    %cst_48 = arith.constant dense<0.000000e+00> : vector<8xf32>
    %113 = vector.multi_reduction <add>, %112, %cst_48 [1] : vector<8x128xf32> to vector<8xf32>
    %114 = vector.shape_cast %113 : vector<8xf32> to vector<8x1xf32>
    %cst_49 = arith.constant 1.000000e-24 : f32
    %115 = vector.broadcast %cst_49 : f32 to vector<8x1xf32>
    %116 = arith.maximumf %114, %115 : vector<8x1xf32>
    %117 = math.rsqrt %116 : vector<8x1xf32>
    %118 = vector.broadcast %117 : vector<8x1xf32> to vector<8x128xf32>
    %119 = arith.mulf %111, %118 : vector<8x128xf32>
    %120 = arith.mulf %119, %9 : vector<8x128xf32>
    %121 = vector.shape_cast %120 : vector<8x128xf32> to vector<1x8x128xf32>
    %cst_50 = arith.constant dense<0.000000e+00> : vector<1xf32>
    %122 = vector.multi_reduction <add>, %121, %cst_50 [1, 2] : vector<1x8x128xf32> to vector<1xf32>
    %123 = vector.shape_cast %122 : vector<1xf32> to vector<1x1x1xf32>
    %124 = vector.extract %123[0, 0, 0] : f32 from vector<1x1x1xf32>
    %cst_51 = arith.constant dense<0.000000e+00> : vector<128xf32>
    %125 = vector.multi_reduction <add>, %119, %cst_51 [0] : vector<8x128xf32> to vector<128xf32>
    %126 = vector.shape_cast %125 : vector<128xf32> to vector<1x128xf32>
    %127 = arith.mulf %126, %11 : vector<1x128xf32>
    %128 = vector.shape_cast %127 : vector<1x128xf32> to vector<1x1x128xf32>
    %cst_52 = arith.constant dense<0.000000e+00> : vector<1xf32>
    %129 = vector.multi_reduction <add>, %128, %cst_52 [1, 2] : vector<1x1x128xf32> to vector<1xf32>
    %130 = vector.shape_cast %129 : vector<1xf32> to vector<1x1x1xf32>
    %131 = vector.extract %130[0, 0, 0] : f32 from vector<1x1x1xf32>
    %132 = arith.subf %131, %124 : f32
    %cst_53 = arith.constant 8.000000e+00 : f32
    %133 = arith.divf %124, %cst_53 : f32
    %c0_54 = arith.constant 0 : index
    %c0_55 = arith.constant 0 : index
    %134 = memref.load %arg7[%c0_54, %c0_55] : memref<1x1xf32, #tpu.memory_space<smem>>
    memref.store %133, %arg7[%c0_54, %c0_55] : memref<1x1xf32, #tpu.memory_space<smem>>
    %cst_56 = arith.constant 5.600000e+01 : f32
    %135 = arith.divf %132, %cst_56 : f32
    %c0_57 = arith.constant 0 : index
    %c0_58 = arith.constant 0 : index
    %136 = memref.load %arg8[%c0_57, %c0_58] : memref<1x1xf32, #tpu.memory_space<smem>>
    memref.store %135, %arg8[%c0_57, %c0_58] : memref<1x1xf32, #tpu.memory_space<smem>>
    return
  }
}

</mosaic_0001>

<bundles_post_ra>
// kernel: tpu_custom_call.1
= control target key start
LH: loop header
LB: loop body
LE: loop exit
PB: predicated region body
PF: predicated region fallthrough
CT: control target
= control target key end

     0   :  { %14 = vsyncpa [#allocation3], 0  ;;  %s1937_s0 = inlined_call_operand.hbm [shape: f32[8,128], index: 0, kind: input, shape index: {}]   ;;  %s1938_s1 = inlined_call_operand.hbm [shape: f32[8,128], index: 1, kind: input, shape index: {}]   ;;  %s1939_s2 = inlined_call_operand.hbm [shape: bf16[128,256], index: 2, kind: input, shape index: {}]   ;;  %s1940_s3 = inlined_call_operand.hbm [shape: bf16[2,256,256], index: 3, kind: input, shape index: {}]   ;;  %s1941_s4 = inlined_call_operand.hbm [shape: bf16[256,128], index: 4, kind: input, shape index: {}]   ;;  %s1942_s5 = inlined_call_operand.vmem [shape: f32[6,256], index: 5, kind: input, shape index: {}]   ;;  %s1943_s6 = inlined_call_operand.vmem [shape: f32[1,128], index: 6, kind: input, shape index: {}]   ;;  %s1944_s7 = inlined_call_operand.hbm [shape: f32[1,1], index: 7, kind: output, shape index: {0}]   ;;  %s1945_s8 = inlined_call_operand.hbm [shape: f32[1,1], index: 8, kind: output, shape index: {1}]  }
   0x1   :  { %15 = vsyncpa [#allocation6], 0 }
   0x2   :  { %16 = vsyncpa [#allocation9], 0 }
   0x3   :  { %17 = vsyncpa [#allocation4], 0 }
   0x4   :  { %18 = vsyncpa [#allocation13], 0  ;;  %s1738_s27 = smov [#allocation5]   ;;  %s1598_s9 = scalar_lea.hbm %s1938_s1, 128 }
   0x5   :  { %s35_s28 = sshll.u32 %s1738_s27, 4  ;;  %p1599_p0 = scmp.ne.s32.totalorder %s1938_s1, %s1598_s9  ;;  %s36_s28 = int_to_ptr.vmem [resolvable:$true] %s35_s28 }
   0x6   :  { %p1602_p1 = scmp.lt.u32.totalorder %s1598_s9, %s1938_s1 }
   0x8   :  { %p1604_p2 = pnand %p1602_p1, %p1599_p0 }
   0xa   :  { %1607 = shalt.err (!%p1604_p2)
}
   0xb   :  { %s1608_s14 = scalar_lea.vmem %s36_s28, 128  ;;  %p1613_p4 = scmp.lt.s32.totalorder %s36_s28, %s36_s28 }
   0xc   :  { %p1609_p3 = scmp.ne.s32.totalorder %s36_s28, %s1608_s14  ;;  %p1614_p5 = scmp.lt.s32.totalorder %s1608_s14, %s1608_s14 }
   0xe   :  { %p1615_p6 = por %p1614_p5, %p1613_p4 }
  0x10   :  { %p1616_p7 = pnand %p1615_p6, %p1609_p3 }
  0x12   :  { %1619 = shalt.err (!%p1616_p7)
}
  0x13   :  { %38 = dma.hbm_to_vmem [thread:$0]  %s1938_s1, 128, %s36_s28, [#allocation6]  }
  0x14   :  { %s1739_s17 = smov [#allocation8]   ;;  %s1740_s19 = smov [#allocation2]  }
  0x15   :  { %s56_s18 = sshll.u32 %s1739_s17, 4  ;;  %s25_s20 = sshll.u32 %s1740_s19, 4  ;;  %s57_s18 = int_to_ptr.vmem [resolvable:$true] %s56_s18  ;;  %s26_s20 = int_to_ptr.vmem [resolvable:$true] %s25_s20 }
  0x16   :  { %s1620_s23 = scalar_lea.hbm %s1940_s3, 8192 }
  0x17   :  { %p1621_p8 = scmp.ne.s32.totalorder %s1940_s3, %s1620_s23  ;;  %p1624_p9 = scmp.lt.u32.totalorder %s1620_s23, %s1940_s3 }
  0x19   :  { %p1626_p10 = pnand %p1624_p9, %p1621_p8 }
  0x1b   :  { %1629 = shalt.err (!%p1626_p10)
}
  0x1c   :  { %s1630_s1 = scalar_lea.vmem %s57_s18, 8192  ;;  %p1635_p12 = scmp.lt.s32.totalorder %s57_s18, %s57_s18 }
  0x1d   :  { %p1631_p11 = scmp.ne.s32.totalorder %s57_s18, %s1630_s1  ;;  %p1636_p13 = scmp.lt.s32.totalorder %s1630_s1, %s1630_s1 }
  0x1f   :  { %p1637_p0 = por %p1636_p13, %p1635_p12 }
  0x21   :  { %p1638_p1 = pnand %p1637_p0, %p1631_p11 }
  0x23   :  { %1641 = shalt.err (!%p1638_p1)
}
  0x24   :  { %s1741_s28 = smov 128   ;;  %s1742_s29 = smov 8  }
  0x25   :  { %62 = dma.hbm_to_vmem [thread:$0]  %s1940_s3, 8192, %s57_s18, [#allocation9], %s1741_s28, %s1741_s28, %s1742_s29  }
  0x26   :  { %s1642_s12 = scalar_lea.hbm %s1937_s0, 128 }
  0x27   :  { %p1643_p2 = scmp.ne.s32.totalorder %s1937_s0, %s1642_s12  ;;  %p1646_p3 = scmp.lt.u32.totalorder %s1642_s12, %s1937_s0 }
  0x29   :  { %p1648_p4 = pnand %p1646_p3, %p1643_p2 }
  0x2b   :  { %1651 = shalt.err (!%p1648_p4)
}
  0x2c   :  { %s1652_s17 = scalar_lea.vmem %s26_s20, 128  ;;  %p1657_p6 = scmp.lt.s32.totalorder %s26_s20, %s26_s20 }
  0x2d   :  { %p1653_p5 = scmp.ne.s32.totalorder %s26_s20, %s1652_s17  ;;  %p1658_p7 = scmp.lt.s32.totalorder %s1652_s17, %s1652_s17 }
  0x2f   :  { %p1659_p8 = por %p1658_p7, %p1657_p6 }
  0x31   :  { %p1660_p9 = pnand %p1659_p8, %p1653_p5 }
  0x33   :  { %1663 = shalt.err (!%p1660_p9)
}
  0x34   :  { %28 = dma.hbm_to_vmem [thread:$0]  %s1937_s0, 128, %s26_s20, [#allocation3]  }
  0x35   :  { %s1743_s19 = smov [#allocation7]   ;;  %s1744_s22 = smov [#allocation10]  }
  0x36   :  { %s44_s21 = sshll.u32 %s1743_s19, 4  ;;  %s68_s23 = sshll.u32 %s1744_s22, 4  ;;  %s45_s21 = int_to_ptr.vmem [resolvable:$true] %s44_s21  ;;  %s69_s23 = int_to_ptr.vmem [resolvable:$true] %s68_s23 }
  0x37   :  { %s1664_s26 = scalar_lea.hbm %s1939_s2, 2048 }
  0x38   :  { %p1665_p10 = scmp.ne.s32.totalorder %s1939_s2, %s1664_s26  ;;  %p1668_p11 = scmp.lt.u32.totalorder %s1664_s26, %s1939_s2 }
  0x3a   :  { %p1670_p12 = pnand %p1668_p11, %p1665_p10 }
  0x3c   :  { %1673 = shalt.err (!%p1670_p12)
}
  0x3d   :  { %s1674_s0 = scalar_lea.vmem %s45_s21, 2048  ;;  %p1679_p0 = scmp.lt.s32.totalorder %s45_s21, %s45_s21 }
  0x3e   :  { %p1675_p13 = scmp.ne.s32.totalorder %s45_s21, %s1674_s0  ;;  %p1680_p1 = scmp.lt.s32.totalorder %s1674_s0, %s1674_s0 }
  0x40   :  { %p1681_p2 = por %p1680_p1, %p1679_p0 }
  0x42   :  { %p1682_p3 = pnand %p1681_p2, %p1675_p13 }
  0x44   :  { %1685 = shalt.err (!%p1682_p3)
}
  0x45   :  { %50 = dma.hbm_to_vmem [thread:$0]  %s1939_s2, 2048, %s45_s21, [#allocation6], %s1741_s28, %s1741_s28, %s1742_s29  }
  0x46   :  { %s1686_s13 = scalar_lea.hbm %s1941_s4, 2048 }
  0x47   :  { %p1687_p4 = scmp.ne.s32.totalorder %s1941_s4, %s1686_s13  ;;  %p1690_p5 = scmp.lt.u32.totalorder %s1686_s13, %s1941_s4 }
  0x49   :  { %p1692_p6 = pnand %p1690_p5, %p1687_p4 }
  0x4b   :  { %1695 = shalt.err (!%p1692_p6)
}
  0x4c   :  { %s1696_s3 = scalar_lea.vmem %s69_s23, 2048  ;;  %p1701_p8 = scmp.lt.s32.totalorder %s69_s23, %s69_s23 }
  0x4d   :  { %p1697_p7 = scmp.ne.s32.totalorder %s69_s23, %s1696_s3  ;;  %p1702_p9 = scmp.lt.s32.totalorder %s1696_s3, %s1696_s3 }
  0x4f   :  { %p1703_p10 = por %p1702_p9, %p1701_p8 }
  0x51   :  { %p1704_p11 = pnand %p1703_p10, %p1697_p7 }
  0x53   :  { %1707 = shalt.err (!%p1704_p11)
}
  0x54   :  { %s1745_s2 = smov 64   ;;  %s1746_s28 = smov 4  }
  0x55   :  { %74 = dma.hbm_to_vmem [thread:$0]  %s1941_s4, 2048, %s69_s23, [#allocation9], %s1745_s2, %s1745_s2, %s1746_s28  }
  0x56   :  { %1728 = dma.done.wait [#allocation3], 128  }
  0x57   :  { %1729 = vsyncadd [#allocation3], 4294967168 }
  0x58   :  { %1730 = dma.done.wait [#allocation6], 2176  }
  0x59   :  { %1731 = vsyncadd [#allocation6], 4294965120 }
  0x5a   :  { %1732 = dma.done.wait [#allocation9], 10240  }
  0x5b   :  { %1733 = vsyncadd [#allocation9], 4294957056  ;;  %v95_v0 = vld [vmem:[#allocation2] sm:$0xff]  ;;  %v1444_v2 = vld [vmem:[#allocation7 + $0x4] ss:$8 sps:$4 sm:$0xff]   ;;  %v1747_v16 = vmov 0  }
  0x5c   :  { %v109_v1 = vmul.f32 %v95_v0, %v95_v0  ;;  %v1446_v3 = vld [vmem:[#allocation7] ss:$8 sps:$4 sm:$0xff]   ;;  %v1447_v4 = vld [vmem:[#allocation7 + $0x14] ss:$8 sps:$4 sm:$0xff]   ;;  %212 = vmatprep.subr.bf16.mxu0 %v1444_v2  ;;  %v1449_v5 = vld [vmem:[#allocation7 + $0x10] ss:$8 sps:$4 sm:$0xff]   ;;  %244 = vmatprep.mubr.bf16.mxu0 %v1747_v16 }
  0x5d   :  { %213 = vmatpush1.bf16.msra.mxu0 %v1446_v3  ;;  %v1450_v6 = vld [vmem:[#allocation7 + $0x24] ss:$8 sps:$4 sm:$0xff]   ;;  %v1452_v7 = vld [vmem:[#allocation7 + $0x20] ss:$8 sps:$4 sm:$0xff]   ;;  %v1453_v8 = vld [vmem:[#allocation7 + $0x34] ss:$8 sps:$4 sm:$0xff]  }
  0x5e   :  { %110 = vadd.xlane.f32.xlu0 %v109_v1  ;;  %214 = vmatprep.subr.bf16.mxu0 %v1447_v4  ;;  %v1455_v9 = vld [vmem:[#allocation7 + $0x30] ss:$8 sps:$4 sm:$0xff]   ;;  %v1456_v10 = vld [vmem:[#allocation7 + $0x44] ss:$8 sps:$4 sm:$0xff]   ;;  %v1458_v11 = vld [vmem:[#allocation7 + $0x40] ss:$8 sps:$4 sm:$0xff]  }
  0x5f   :  { %v1459_v12 = vld [vmem:[#allocation7 + $0x54] ss:$8 sps:$4 sm:$0xff]   ;;  %v1461_v13 = vld [vmem:[#allocation7 + $0x50] ss:$8 sps:$4 sm:$0xff]   ;;  %v1462_v14 = vld [vmem:[#allocation7 + $0x64] ss:$8 sps:$4 sm:$0xff]  }
  0x60   :  { %v1464_v15 = vld [vmem:[#allocation7 + $0x60] ss:$8 sps:$4 sm:$0xff]   ;;  %v1465_v17 = vld [vmem:[#allocation7 + $0x74] ss:$8 sps:$4 sm:$0xff]   ;;  %v1467_v18 = vld [vmem:[#allocation7 + $0x70] ss:$8 sps:$4 sm:$0xff]  }
  0x61   :  { %215 = vmatpush1.bf16.msra.mxu0 %v1449_v5  ;;  %v1468_v19 = vld [vmem:[#allocation8 + $0x4] ss:$8 sps:$4 sm:$0xff]   ;;  %v1470_v20 = vld [vmem:[#allocation8] ss:$8 sps:$4 sm:$0xff]   ;;  %v1471_v26 = vld [vmem:[#allocation8 + $0x14] ss:$8 sps:$4 sm:$0xff]  }
  0x62   :  { %216 = vmatprep.subr.bf16.mxu0 %v1450_v6  ;;  %556 = vmatprep.subr.bf16.mxu1 %v1468_v19  ;;  %v1473_v27 = vld [vmem:[#allocation8 + $0x10] ss:$8 sps:$4 sm:$0xff]   ;;  %v1474_v28 = vld [vmem:[#allocation8 + $0x24] ss:$8 sps:$4 sm:$0xff]   ;;  %v1476_v29 = vld [vmem:[#allocation8 + $0x20] ss:$8 sps:$4 sm:$0xff]  }
  0x63   :  { %557 = vmatpush1.bf16.msra.mxu1 %v1470_v20  ;;  %v1477_v30 = vld [vmem:[#allocation8 + $0x34] ss:$8 sps:$4 sm:$0xff]   ;;  %v1479_v31 = vld [vmem:[#allocation8 + $0x30] ss:$8 sps:$4 sm:$0xff]   ;;  %v1480_v32 = vld [vmem:[#allocation8 + $0x44] ss:$8 sps:$4 sm:$0xff]  }
  0x64   :  { %558 = vmatprep.subr.bf16.mxu1 %v1471_v26  ;;  %v1482_v33 = vld [vmem:[#allocation8 + $0x40] ss:$8 sps:$4 sm:$0xff]   ;;  %v1483_v34 = vld [vmem:[#allocation8 + $0x54] ss:$8 sps:$4 sm:$0xff]   ;;  %v1485_v35 = vld [vmem:[#allocation8 + $0x50] ss:$8 sps:$4 sm:$0xff]  }
  0x65   :  { %217 = vmatpush1.bf16.msra.mxu0 %v1452_v7  ;;  %v1486_v36 = vld [vmem:[#allocation8 + $0x64] ss:$8 sps:$4 sm:$0xff]   ;;  %v1488_v37 = vld [vmem:[#allocation8 + $0x60] ss:$8 sps:$4 sm:$0xff]   ;;  %v1489_v38 = vld [vmem:[#allocation8 + $0x74] ss:$8 sps:$4 sm:$0xff]  }
  0x66   :  { %218 = vmatprep.subr.bf16.mxu0 %v1453_v8  ;;  %v1491_v39 = vld [vmem:[#allocation8 + $0x70] ss:$8 sps:$4 sm:$0xff]   ;;  %v1492_v40 = vld [vmem:[#allocation8 + $0x84] ss:$8 sps:$4 sm:$0xff]   ;;  %v1494_v41 = vld [vmem:[#allocation8 + $0x80] ss:$8 sps:$4 sm:$0xff]  }
  0x67   :  { %559 = vmatpush1.bf16.msra.mxu1 %v1473_v27  ;;  %v1495_v42 = vld [vmem:[#allocation8 + $0x94] ss:$8 sps:$4 sm:$0xff]   ;;  %v1497_v43 = vld [vmem:[#allocation8 + $0x90] ss:$8 sps:$4 sm:$0xff]   ;;  %v1498_v44 = vld [vmem:[#allocation8 + $0xa4] ss:$8 sps:$4 sm:$0xff]  }
  0x68   :  { %560 = vmatprep.subr.bf16.mxu1 %v1474_v28  ;;  %v1500_v45 = vld [vmem:[#allocation8 + $0xa0] ss:$8 sps:$4 sm:$0xff]   ;;  %v1501_v46 = vld [vmem:[#allocation8 + $0xb4] ss:$8 sps:$4 sm:$0xff]   ;;  %v1503_v47 = vld [vmem:[#allocation8 + $0xb0] ss:$8 sps:$4 sm:$0xff]  }
  0x69   :  { %219 = vmatpush1.bf16.msra.mxu0 %v1455_v9  ;;  %v1504_v48 = vld [vmem:[#allocation8 + $0xc4] ss:$8 sps:$4 sm:$0xff]   ;;  %v1506_v49 = vld [vmem:[#allocation8 + $0xc0] ss:$8 sps:$4 sm:$0xff]   ;;  %v1507_v50 = vld [vmem:[#allocation8 + $0xd4] ss:$8 sps:$4 sm:$0xff]  }
  0x6a   :  { %220 = vmatprep.subr.bf16.mxu0 %v1456_v10  ;;  %v1509_v51 = vld [vmem:[#allocation8 + $0xd0] ss:$8 sps:$4 sm:$0xff]   ;;  %v1510_v52 = vld [vmem:[#allocation8 + $0xe4] ss:$8 sps:$4 sm:$0xff]   ;;  %v1512_v53 = vld [vmem:[#allocation8 + $0xe0] ss:$8 sps:$4 sm:$0xff]  }
  0x6b   :  { %561 = vmatpush1.bf16.msra.mxu1 %v1476_v29  ;;  %v1513_v54 = vld [vmem:[#allocation8 + $0xf4] ss:$8 sps:$4 sm:$0xff]   ;;  %v1515_v55 = vld [vmem:[#allocation8 + $0xf0] ss:$8 sps:$4 sm:$0xff]   ;;  %v1516_v56 = vld [vmem:[#allocation8 + $0x100] ss:$8 sps:$4 sm:$0xff]  }
  0x6c   :  { %562 = vmatprep.subr.bf16.mxu1 %v1477_v30  ;;  %v1518_v57 = vld [vmem:[#allocation8 + $0x104] ss:$8 sps:$4 sm:$0xff]   ;;  %vm1253_vm0 = vcmask 1040384   ;;  %s1708_s12 = scalar_lea.hbm %s1944_s7, 16 }
  0x6d   :  { %221 = vmatpush1.bf16.msra.mxu0 %v1458_v11  ;;  %p1709_p12 = scmp.ne.s32.totalorder %s1944_s7, %s1708_s12  ;;  %p1712_p13 = scmp.lt.u32.totalorder %s1708_s12, %s1944_s7 }
  0x6e   :  { %222 = vmatprep.subr.bf16.mxu0 %v1459_v12 }
  0x6f   :  { %563 = vmatpush1.bf16.msra.mxu1 %v1479_v31  ;;  %p1714_p0 = pnand %p1712_p13, %p1709_p12 }
  0x70   :  { %564 = vmatprep.subr.bf16.mxu1 %v1480_v32 }
  0x71   :  { %223 = vmatpush1.bf16.msra.mxu0 %v1461_v13 }
  0x72   :  { %224 = vmatprep.subr.bf16.mxu0 %v1462_v14 }
  0x73   :  { %565 = vmatpush1.bf16.msra.mxu1 %v1482_v33 }
  0x74   :  { %566 = vmatprep.subr.bf16.mxu1 %v1483_v34  ;;  %v1748_v34 = vmov 1966171168  }
  0x75   :  { %225 = vmatpush1.bf16.msra.mxu0 %v1464_v15 }
  0x76   :  { %226 = vmatprep.subr.bf16.mxu0 %v1465_v17 }
  0x77   :  { %567 = vmatpush1.bf16.msra.mxu1 %v1485_v35  ;;  %v298_v35 = vunpack.c.l.s4 %v1748_v34 }
  0x78   :  { %568 = vmatprep.subr.bf16.mxu1 %v1486_v36  ;;  %v300_v36 = vlaneseq }
  0x79   :  { %227 = vmatpush1.bf16.msra.mxu0 %v1467_v18 }
  0x7a   :  { %902 = vmatprep.subr.bf16.mxu0 %v1518_v57  ;;  %v1319_v57 = vld [vmem:[%s1942_s5 + $0x1] ss:$8 sm:$0x3] }
  0x7b   :  { %569 = vmatpush1.bf16.msra.mxu1 %v1488_v37  ;;  %v299_v37 = vunpack.c.0.s8 %v298_v35 }
  0x7c   :  { %570 = vmatprep.subr.bf16.mxu1 %v1489_v38  ;;  %v301_v38 = vshrl.u32 %v300_v36, 7 }
  0x7f   :  { %571 = vmatpush1.bf16.msra.mxu1 %v1491_v39 }
  0x80   :  { %572 = vmatprep.subr.bf16.mxu1 %v1492_v40  ;;  %v1862_v40 = vsub.s32 %v299_v37, %v301_v38 }
  0x83   :  { %573 = vmatpush1.bf16.msra.mxu1 %v1494_v41 }
  0x84   :  { %574 = vmatprep.subr.bf16.mxu1 %v1495_v42 }
  0x87   :  { %575 = vmatpush1.bf16.msra.mxu1 %v1497_v43 }
  0x88   :  { %576 = vmatprep.subr.bf16.mxu1 %v1498_v44  ;;  %v253_v44 = vld [vmem:[%s1942_s5] ss:$8 sm:$0x3] }
  0x8b   :  { %577 = vmatpush1.bf16.msra.mxu1 %v1500_v45 }
  0x8c   :  { %578 = vmatprep.subr.bf16.mxu1 %v1501_v46  ;;  %v1869_v46 = vsub.s32 0, %v301_v38 }
  0x8f   :  { %579 = vmatpush1.bf16.msra.mxu1 %v1503_v47  ;;  %v1871_v47 = vsub.s32 1, %v301_v38 }
  0x90   :  { %580 = vmatprep.subr.bf16.mxu1 %v1504_v48 }
  0x93   :  { %581 = vmatpush1.bf16.msra.mxu1 %v1506_v49 }
  0x94   :  { %582 = vmatprep.subr.bf16.mxu1 %v1507_v50 }
  0x97   :  { %583 = vmatpush1.bf16.msra.mxu1 %v1509_v51 }
  0x98   :  { %584 = vmatprep.subr.bf16.mxu1 %v1510_v52 }
  0x9b   :  { %585 = vmatpush1.bf16.msra.mxu1 %v1512_v53 }
  0x9c   :  { %586 = vmatprep.subr.bf16.mxu1 %v1513_v54 }
  0x9f   :  { %587 = vmatpush1.bf16.msra.mxu1 %v1515_v55 }
  0xeb   :  { %v111_v21 = vpop.xlane.xlu0 %110 }
  0xec   :  { %v112_v22 = vmax.f32 %v111_v21, 1e-24 }
  0xee   :  { %1580 = vrsqrt.f32 %v112_v22 }
  0xf8   :  { %v1581_v23 = vpop.eup %1580 }
  0xf9   :  { %v114_v24 = vmul.f32 %v1581_v23, %v95_v0 }
  0xfb   :  { %v115_v25 = vpack.c.bf16 %v114_v24, %v114_v24 }
  0xfd   :  { %245 = vmatmul.mubr.bf16.vlgmr.msra.gmra.mrb[0].mxu0 %v115_v25 }
  0xfe   :  { %903 = vmatpush1.bf16.msra.mxu0 %v1516_v56 }
 0x1d0   :  { %v246_v58 = vpop.f32.mrb[0].mxu0 }
 0x1d1   :  { %v256_v59 = vrot.slane %v246_v58, 4  ;;  %v268_v60 = vmul.f32 %v246_v58, %v246_v58  ;;  %v248_v61 = vpop.f32.mrb[1].mxu0 }
 0x1d2   :  { %v262_v62 = vrot.slane %v248_v61, 4  ;;  %v269_v63 = vmul.f32 %v248_v61, %v248_v61  ;;  %v250_v0 = vpop.f32.mrb[2].mxu0 }
 0x1d3   :  { %v257_v1 = vadd.f32 %v256_v59, %v246_v58  ;;  %v270_v2 = vrot.slane %v268_v60, 4  ;;  %v251_v3 = vpop.f32.mrb[3].mxu0 }
 0x1d4   :  { %v263_v4 = vadd.f32 %v262_v62, %v248_v61  ;;  %v276_v5 = vrot.slane %v269_v63, 4 }
 0x1d5   :  { %v258_v6 = vrot.slane %v257_v1, 2  ;;  %v271_v7 = vadd.f32 %v270_v2, %v268_v60 }
 0x1d6   :  { %v264_v8 = vrot.slane %v263_v4, 2  ;;  %v277_v9 = vadd.f32 %v276_v5, %v269_v63  ;;  %v1519_v5 = vld [vmem:[#allocation8 + $0x110] ss:$8 sps:$4 sm:$0xff]  }
 0x1d7   :  { %v259_v10 = vadd.f32 %v258_v6, %v257_v1  ;;  %v272_v11 = vrot.slane %v271_v7, 2  ;;  %v1524_v6 = vld [vmem:[#allocation8 + $0x124] ss:$8 sps:$4 sm:$0xff]  }
 0x1d8   :  { %v265_v12 = vadd.f32 %v264_v8, %v263_v4  ;;  %v278_v13 = vrot.slane %v277_v9, 2  ;;  %v1521_v4 = vld [vmem:[#allocation8 + $0x114] ss:$8 sps:$4 sm:$0xff]  }
 0x1d9   :  { %v260_v14 = vrot.slane %v259_v10, 1  ;;  %v273_v15 = vadd.f32 %v272_v11, %v271_v7  ;;  %904 = vmatprep.subr.bf16.mxu0 %v1521_v4  ;;  %v1522_v7 = vld [vmem:[#allocation8 + $0x120] ss:$8 sps:$4 sm:$0xff]   ;;  %v1527_v8 = vld [vmem:[#allocation8 + $0x134] ss:$8 sps:$4 sm:$0xff]  }
 0x1da   :  { %v266_v16 = vrot.slane %v265_v12, 1  ;;  %v279_v17 = vadd.f32 %v278_v13, %v277_v9  ;;  %905 = vmatpush1.bf16.msra.mxu0 %v1519_v5  ;;  %v1525_v9 = vld [vmem:[#allocation8 + $0x130] ss:$8 sps:$4 sm:$0xff]   ;;  %v1528_v11 = vld [vmem:[#allocation8 + $0x140] ss:$8 sps:$4 sm:$0xff]  }
 0x1db   :  { %v261_v18 = vadd.f32 %v260_v14, %v259_v10  ;;  %v274_v19 = vrot.slane %v273_v15, 1  ;;  %906 = vmatprep.subr.bf16.mxu0 %v1524_v6  ;;  %v1530_v10 = vld [vmem:[#allocation8 + $0x144] ss:$8 sps:$4 sm:$0xff]   ;;  %v1531_v13 = vld [vmem:[#allocation8 + $0x150] ss:$8 sps:$4 sm:$0xff]  }
 0x1dc   :  { %v280_v20 = vrot.slane %v279_v17, 1  ;;  %v267_v21 = vadd.f32 %v266_v16, %v265_v12  ;;  %v1533_v12 = vld [vmem:[#allocation8 + $0x154] ss:$8 sps:$4 sm:$0xff]   ;;  %v1536_v14 = vld [vmem:[#allocation8 + $0x164] ss:$8 sps:$4 sm:$0xff]  }
 0x1dd   :  { %v275_v22 = vadd.f32 %v274_v19, %v273_v15  ;;  %v282_v23 = vmul.f32 0.125, %v261_v18  ;;  %v1534_v15 = vld [vmem:[#allocation8 + $0x160] ss:$8 sps:$4 sm:$0xff]   ;;  %v1539_v16 = vld [vmem:[#allocation8 + $0x174] ss:$8 sps:$4 sm:$0xff]  }
 0x1de   :  { %v281_v24 = vadd.f32 %v280_v20, %v279_v17  ;;  %v283_v25 = vmul.f32 0.125, %v267_v21  ;;  %907 = vmatpush1.bf16.msra.mxu0 %v1522_v7  ;;  %v1537_v17 = vld [vmem:[#allocation8 + $0x170] ss:$8 sps:$4 sm:$0xff]   ;;  %v1542_v18 = vld [vmem:[#allocation8 + $0x184] ss:$8 sps:$4 sm:$0xff]  }
 0x1df   :  { %v284_v26 = vmul.f32 0.125, %v275_v22  ;;  %v286_v27 = vmul.f32 %v282_v23, %v282_v23  ;;  %908 = vmatprep.subr.bf16.mxu0 %v1527_v8  ;;  %v1540_v19 = vld [vmem:[#allocation8 + $0x180] ss:$8 sps:$4 sm:$0xff]   ;;  %v1545_v20 = vld [vmem:[#allocation8 + $0x194] ss:$8 sps:$4 sm:$0xff]  }
 0x1e0   :  { %v285_v28 = vmul.f32 0.125, %v281_v24  ;;  %v287_v29 = vmul.f32 %v283_v25, %v283_v25  ;;  %v1543_v21 = vld [vmem:[#allocation8 + $0x190] ss:$8 sps:$4 sm:$0xff]   ;;  %v1548_v22 = vld [vmem:[#allocation8 + $0x1a4] ss:$8 sps:$4 sm:$0xff]  }
 0x1e1   :  { %v288_v30 = vsub.f32 %v284_v26, %v286_v27  ;;  %v1551_v24 = vld [vmem:[#allocation8 + $0x1b4] ss:$8 sps:$4 sm:$0xff]   ;;  %v1554_v26 = vld [vmem:[#allocation8 + $0x1c4] ss:$8 sps:$4 sm:$0xff]   ;;  %v1552_v27 = vld [vmem:[#allocation8 + $0x1c0] ss:$8 sps:$4 sm:$0xff]  }
 0x1e2   :  { %v289_v31 = vsub.f32 %v285_v28, %v287_v29  ;;  %909 = vmatpush1.bf16.msra.mxu0 %v1525_v9  ;;  %v1557_v28 = vld [vmem:[#allocation8 + $0x1d4] ss:$8 sps:$4 sm:$0xff]   ;;  %v1555_v29 = vld [vmem:[#allocation8 + $0x1d0] ss:$8 sps:$4 sm:$0xff]  }
 0x1e3   :  { %v290_v32 = vadd.f32 1e-05, %v288_v30  ;;  %910 = vmatprep.subr.bf16.mxu0 %v1530_v10  ;;  %v1560_v30 = vld [vmem:[#allocation8 + $0x1e4] ss:$8 sps:$4 sm:$0xff]  }
 0x1e4   :  { %v291_v33 = vadd.f32 1e-05, %v289_v31  ;;  %v1558_v31 = vld [vmem:[#allocation8 + $0x1e0] ss:$8 sps:$4 sm:$0xff]  }
 0x1e5   :  { %1582 = vrsqrt.f32 %v290_v32  ;;  %v1563_v32 = vld [vmem:[#allocation8 + $0x1f4] ss:$8 sps:$4 sm:$0xff]  }
 0x1e6   :  { %1584 = vrsqrt.f32 %v291_v33  ;;  %911 = vmatpush1.bf16.msra.mxu0 %v1528_v11  ;;  %v1561_v33 = vld [vmem:[#allocation8 + $0x1f0] ss:$8 sps:$4 sm:$0xff]  }
 0x1e7   :  { %912 = vmatprep.subr.bf16.mxu0 %v1533_v12 }
 0x1ea   :  { %913 = vmatpush1.bf16.msra.mxu0 %v1531_v13 }
 0x1eb   :  { %914 = vmatprep.subr.bf16.mxu0 %v1536_v14 }
 0x1ee   :  { %915 = vmatpush1.bf16.msra.mxu0 %v1534_v15 }
 0x1ef   :  { %v1583_v39 = vpop.eup %1582  ;;  %916 = vmatprep.subr.bf16.mxu0 %v1539_v16 }
 0x1f0   :  { %v1585_v41 = vpop.eup %1584 }
 0x1f1   :  { %v296_v42 = vcombine.low %v1583_v39, %v1585_v41 }
 0x1f2   :  { %917 = vmatpush1.bf16.msra.mxu0 %v1537_v17  ;;  %v1352_v17 = vld [vmem:[%s1942_s5 + $0x2] ss:$8 sm:$0x3] }
 0x1f3   :  { %v303_v43 = vrot.slane %v296_v42, %v1862_v40  ;;  %918 = vmatprep.subr.bf16.mxu0 %v1542_v18 }
 0x1f5   :  { %v310_v45 = vrot.slane %v303_v43, %v1862_v40 }
 0x1f6   :  { %919 = vmatpush1.bf16.msra.mxu0 %v1540_v19 }
 0x1f7   :  { %v312_v48 = vmul.f32 %v310_v45, %v253_v44  ;;  %920 = vmatprep.subr.bf16.mxu0 %v1545_v20 }
 0x1f9   :  { %v317_v49 = vrot.slane %v312_v48, %v1869_v46  ;;  %v321_v50 = vrot.slane %v312_v48, %v1871_v47 }
 0x1fa   :  { %921 = vmatpush1.bf16.msra.mxu0 %v1543_v21 }
 0x1fb   :  { %v324_v51 = vmul.f32 %v317_v49, %v282_v23  ;;  %v325_v52 = vmul.f32 %v321_v50, %v283_v25  ;;  %v346_v53 = vmul.f32 %v321_v50, %v248_v61  ;;  %v345_v54 = vmul.f32 %v317_v49, %v246_v58  ;;  %v1546_v23 = vld [vmem:[#allocation8 + $0x1a0] ss:$8 sps:$4 sm:$0xff]   ;;  %922 = vmatprep.subr.bf16.mxu0 %v1548_v22  ;;  %v1549_v25 = vld [vmem:[#allocation8 + $0x1b0] ss:$8 sps:$4 sm:$0xff]  }
 0x1fd   :  { %v328_v55 = vcombine.low %v324_v51, %v325_v52 }
 0x1fe   :  { %923 = vmatpush1.bf16.msra.mxu0 %v1546_v23 }
 0x1ff   :  { %v335_v56 = vrot.slane %v328_v55, %v1862_v40  ;;  %924 = vmatprep.subr.bf16.mxu0 %v1551_v24 }
 0x201   :  { %v342_v59 = vrot.slane %v335_v56, %v1862_v40 }
 0x202   :  { %925 = vmatpush1.bf16.msra.mxu0 %v1549_v25 }
 0x203   :  { %v344_v60 = vsub.f32 %v1319_v57, %v342_v59  ;;  %926 = vmatprep.subr.bf16.mxu0 %v1554_v26 }
 0x205   :  { %v355_v62 = vrot.slane %v344_v60, %v1871_v47  ;;  %v351_v63 = vrot.slane %v344_v60, %v1869_v46 }
 0x206   :  { %927 = vmatpush1.bf16.msra.mxu0 %v1552_v27 }
 0x207   :  { %v359_v0 = vadd.f32 %v355_v62, %v346_v53  ;;  %v358_v1 = vadd.f32 %v351_v63, %v345_v54  ;;  %928 = vmatprep.subr.bf16.mxu0 %v1557_v28  ;;  %v1353_v28 = vld [vmem:[%s1942_s5 + $0x3] ss:$8 sm:$0x3] }
 0x209   :  { %v361_v2 = vmax.f32 %v359_v0, 0.0  ;;  %v360_v3 = vmax.f32 %v358_v1, 0.0 }
 0x20a   :  { %929 = vmatpush1.bf16.msra.mxu0 %v1555_v29 }
 0x20b   :  { %v363_v61 = vpack.c.bf16 %v361_v2, %v361_v2  ;;  %v362_v58 = vpack.c.bf16 %v360_v3, %v360_v3  ;;  %930 = vmatprep.subr.bf16.mxu0 %v1560_v30 }
 0x20d   :  { %588 = vmatprep.mubr.bf16.mxu1 %v363_v61 }
 0x20e   :  { %589 = vmatmul.mubr.bf16.vlgmr.msra.gmra.mrb[0].mxu1 %v362_v58  ;;  %931 = vmatpush1.bf16.msra.mxu0 %v1558_v31 }
 0x20f   :  { %932 = vmatprep.subr.bf16.mxu0 %v1563_v32 }
 0x212   :  { %933 = vmatpush1.bf16.msra.mxu0 %v1561_v33 }
 0x2e1   :  { %v590_v34 = vpop.f32.mrb[0].mxu1 }
 0x2e2   :  { %v601_v35 = vrot.slane %v590_v34, 4  ;;  %v613_v36 = vmul.f32 %v590_v34, %v590_v34  ;;  %v592_v37 = vpop.f32.mrb[1].mxu1 }
 0x2e3   :  { %v607_v38 = vrot.slane %v592_v37, 4  ;;  %v614_v39 = vmul.f32 %v592_v37, %v592_v37  ;;  %v594_v41 = vpop.f32.mrb[2].mxu1 }
 0x2e4   :  { %v602_v42 = vadd.f32 %v601_v35, %v590_v34  ;;  %v615_v43 = vrot.slane %v613_v36, 4  ;;  %v595_v44 = vpop.f32.mrb[3].mxu1  ;;  %v1565_v41 = vld [vmem:[#allocation10] sm:$0xff]  }
 0x2e5   :  { %v608_v45 = vadd.f32 %v607_v38, %v592_v37  ;;  %v621_v48 = vrot.slane %v614_v39, 4  ;;  %v1568_v44 = vld [vmem:[#allocation10 + $0x50] sm:$0xff]  }
 0x2e6   :  { %v603_v49 = vrot.slane %v602_v42, 2  ;;  %v616_v50 = vadd.f32 %v615_v43, %v613_v36  ;;  %v1567_v43 = vld [vmem:[#allocation10 + $0x8] sm:$0xff]  }
 0x2e7   :  { %v609_v51 = vrot.slane %v608_v45, 2  ;;  %v622_v52 = vadd.f32 %v621_v48, %v614_v39  ;;  %v1564_v39 = vld [vmem:[#allocation10 + $0x40] sm:$0xff]   ;;  %v1570_v48 = vld [vmem:[#allocation10 + $0x58] sm:$0xff]  }
 0x2e8   :  { %v604_v53 = vadd.f32 %v603_v49, %v602_v42  ;;  %v617_v54 = vrot.slane %v616_v50, 2  ;;  %1405 = vmatprep.subr.bf16.mxu1 %v1564_v39  ;;  %v1566_v42 = vld [vmem:[#allocation10 + $0x48] sm:$0xff]   ;;  %v1571_v49 = vld [vmem:[#allocation10 + $0x18] sm:$0xff]  }
 0x2e9   :  { %v610_v55 = vadd.f32 %v609_v51, %v608_v45  ;;  %v623_v56 = vrot.slane %v622_v52, 2  ;;  %1406 = vmatpush3.bf16.msra.mxu1 %v1565_v41  ;;  %v1569_v45 = vld [vmem:[#allocation10 + $0x10] sm:$0xff]   ;;  %v1573_v51 = vld [vmem:[#allocation10 + $0x20] sm:$0xff]  }
 0x2ea   :  { %v605_v57 = vrot.slane %v604_v53, 1  ;;  %v618_v59 = vadd.f32 %v617_v54, %v616_v50  ;;  %1407 = vmatprep.subr.bf16.mxu1 %v1566_v42  ;;  %v1572_v50 = vld [vmem:[#allocation10 + $0x60] sm:$0xff]   ;;  %v1576_v54 = vld [vmem:[#allocation10 + $0x70] sm:$0xff]  }
 0x2eb   :  { %v611_v60 = vrot.slane %v610_v55, 1  ;;  %v624_v62 = vadd.f32 %v623_v56, %v622_v52  ;;  %v1574_v52 = vld [vmem:[#allocation10 + $0x68] sm:$0xff]   ;;  %v1578_v56 = vld [vmem:[#allocation10 + $0x78] sm:$0xff]  }
 0x2ec   :  { %v606_v63 = vadd.f32 %v605_v57, %v604_v53  ;;  %v619_v0 = vrot.slane %v618_v59, 1  ;;  %v1575_v53 = vld [vmem:[#allocation10 + $0x28] sm:$0xff]   ;;  %v1579_v57 = vld [vmem:[#allocation10 + $0x38] sm:$0xff]  }
 0x2ed   :  { %v612_v1 = vadd.f32 %v611_v60, %v610_v55  ;;  %v625_v2 = vrot.slane %v624_v62, 1  ;;  %1408 = vmatpush3.bf16.msra.mxu1 %v1567_v43  ;;  %v1577_v55 = vld [vmem:[#allocation10 + $0x30] sm:$0xff]  }
 0x2ee   :  { %v620_v3 = vadd.f32 %v619_v0, %v618_v59  ;;  %v627_v61 = vmul.f32 0.125, %v606_v63  ;;  %1409 = vmatprep.subr.bf16.mxu1 %v1568_v44 }
 0x2ef   :  { %v626_v58 = vadd.f32 %v625_v2, %v624_v62  ;;  %v628_v4 = vmul.f32 0.125, %v612_v1 }
 0x2f0   :  { %v629_v5 = vmul.f32 0.125, %v620_v3  ;;  %v631_v6 = vmul.f32 %v627_v61, %v627_v61 }
 0x2f1   :  { %v630_v7 = vmul.f32 0.125, %v626_v58  ;;  %v632_v8 = vmul.f32 %v628_v4, %v628_v4  ;;  %1410 = vmatpush3.bf16.msra.mxu1 %v1569_v45 }
 0x2f2   :  { %v633_v9 = vsub.f32 %v629_v5, %v631_v6  ;;  %1411 = vmatprep.subr.bf16.mxu1 %v1570_v48 }
 0x2f3   :  { %v634_v10 = vsub.f32 %v630_v7, %v632_v8 }
 0x2f4   :  { %v635_v11 = vadd.f32 1e-05, %v633_v9 }
 0x2f5   :  { %v636_v12 = vadd.f32 1e-05, %v634_v10  ;;  %1412 = vmatpush3.bf16.msra.mxu1 %v1571_v49 }
 0x2f6   :  { %1586 = vrsqrt.f32 %v635_v11  ;;  %1413 = vmatprep.subr.bf16.mxu1 %v1572_v50 }
 0x2f7   :  { %1588 = vrsqrt.f32 %v636_v12 }
 0x2f9   :  { %1414 = vmatpush3.bf16.msra.mxu1 %v1573_v51 }
 0x2fa   :  { %1415 = vmatprep.subr.bf16.mxu1 %v1574_v52  ;;  %v1387_v52 = vld [vmem:[%s1942_s5 + $0x5] ss:$8 sm:$0x3] }
 0x2fd   :  { %1416 = vmatpush3.bf16.msra.mxu1 %v1575_v53 }
 0x2fe   :  { %1417 = vmatprep.subr.bf16.mxu1 %v1576_v54 }
 0x300   :  { %v1587_v13 = vpop.eup %1586 }
 0x301   :  { %v1589_v14 = vpop.eup %1588  ;;  %1418 = vmatpush3.bf16.msra.mxu1 %v1577_v55 }
 0x302   :  { %v641_v15 = vcombine.low %v1587_v13, %v1589_v14  ;;  %1419 = vmatprep.subr.bf16.mxu1 %v1578_v56 }
 0x304   :  { %v648_v16 = vrot.slane %v641_v15, %v1862_v40 }
 0x305   :  { %1420 = vmatpush3.bf16.msra.mxu1 %v1579_v57 }
 0x306   :  { %v655_v18 = vrot.slane %v648_v16, %v1862_v40 }
 0x308   :  { %v657_v19 = vmul.f32 %v1352_v17, %v655_v18 }
 0x30a   :  { %v662_v20 = vrot.slane %v657_v19, %v1869_v46  ;;  %v666_v21 = vrot.slane %v657_v19, %v1871_v47 }
 0x30c   :  { %v669_v22 = vmul.f32 %v662_v20, %v627_v61  ;;  %v670_v23 = vmul.f32 %v666_v21, %v628_v4  ;;  %v691_v24 = vmul.f32 %v666_v21, %v592_v37  ;;  %v690_v25 = vmul.f32 %v662_v20, %v590_v34 }
 0x30e   :  { %v673_v26 = vcombine.low %v669_v22, %v670_v23 }
 0x310   :  { %v680_v27 = vrot.slane %v673_v26, %v1862_v40 }
 0x312   :  { %v687_v29 = vrot.slane %v680_v27, %v1862_v40 }
 0x314   :  { %v689_v30 = vsub.f32 %v1353_v28, %v687_v29 }
 0x316   :  { %v700_v31 = vrot.slane %v689_v30, %v1871_v47  ;;  %v696_v32 = vrot.slane %v689_v30, %v1869_v46 }
 0x318   :  { %v704_v33 = vadd.f32 %v700_v31, %v691_v24  ;;  %v703_v35 = vadd.f32 %v696_v32, %v690_v25 }
 0x31a   :  { %v706_v36 = vmax.f32 %v704_v33, 0.0  ;;  %v705_v38 = vmax.f32 %v703_v35, 0.0 }
 0x31c   :  { %v708_v37 = vpack.c.bf16 %v706_v36, %v706_v36  ;;  %v707_v34 = vpack.c.bf16 %v705_v38, %v705_v38 }
 0x31e   :  { %934 = vmatprep.mubr.bf16.mxu0 %v708_v37 }
 0x31f   :  { %935 = vmatmul.mubr.bf16.vlgmr.msra.gmra.mrb[4].mxu0 %v707_v34  ;;  %v1386_v34 = vld [vmem:[%s1942_s5 + $0x4] ss:$8 sm:$0x3] }
 0x3f2   :  { %v936_v59 = vpop.f32.mrb[4].mxu0 }
 0x3f3   :  { %v947_v60 = vrot.slane %v936_v59, 4  ;;  %v959_v62 = vmul.f32 %v936_v59, %v936_v59  ;;  %v938_v63 = vpop.f32.mrb[5].mxu0 }
 0x3f4   :  { %v953_v0 = vrot.slane %v938_v63, 4  ;;  %v960_v1 = vmul.f32 %v938_v63, %v938_v63  ;;  %v940_v2 = vpop.f32.mrb[6].mxu0 }
 0x3f5   :  { %v948_v3 = vadd.f32 %v947_v60, %v936_v59  ;;  %v961_v61 = vrot.slane %v959_v62, 4  ;;  %v941_v58 = vpop.f32.mrb[7].mxu0 }
 0x3f6   :  { %v954_v4 = vadd.f32 %v953_v0, %v938_v63  ;;  %v967_v5 = vrot.slane %v960_v1, 4 }
 0x3f7   :  { %v949_v6 = vrot.slane %v948_v3, 2  ;;  %v962_v7 = vadd.f32 %v961_v61, %v959_v62 }
 0x3f8   :  { %v955_v8 = vrot.slane %v954_v4, 2  ;;  %v968_v9 = vadd.f32 %v967_v5, %v960_v1  ;;  %v96_v1 = vld [vmem:[#allocation5] sm:$0xff] }
 0x3f9   :  { %v950_v10 = vadd.f32 %v949_v6, %v948_v3  ;;  %v963_v11 = vrot.slane %v962_v7, 2  ;;  %v97_v2 = vmul.f32 %v96_v1, %v96_v1 }
 0x3fa   :  { %v956_v12 = vadd.f32 %v955_v8, %v954_v4  ;;  %v969_v13 = vrot.slane %v968_v9, 2 }
 0x3fb   :  { %v951_v14 = vrot.slane %v950_v10, 1  ;;  %v964_v15 = vadd.f32 %v963_v11, %v962_v7  ;;  %98 = vadd.xlane.f32.xlu0 %v97_v2 }
 0x3fc   :  { %v957_v16 = vrot.slane %v956_v12, 1  ;;  %v970_v17 = vadd.f32 %v969_v13, %v968_v9 }
 0x3fd   :  { %v952_v18 = vadd.f32 %v951_v14, %v950_v10  ;;  %v965_v19 = vrot.slane %v964_v15, 1 }
 0x3fe   :  { %v958_v20 = vadd.f32 %v957_v16, %v956_v12  ;;  %v971_v21 = vrot.slane %v970_v17, 1 }
 0x3ff   :  { %v966_v22 = vadd.f32 %v965_v19, %v964_v15  ;;  %v973_v23 = vmul.f32 0.125, %v952_v18 }
 0x400   :  { %v972_v24 = vadd.f32 %v971_v21, %v970_v17  ;;  %v974_v25 = vmul.f32 0.125, %v958_v20 }
 0x401   :  { %v975_v26 = vmul.f32 0.125, %v966_v22  ;;  %v977_v27 = vmul.f32 %v973_v23, %v973_v23 }
 0x402   :  { %v976_v28 = vmul.f32 0.125, %v972_v24  ;;  %v978_v29 = vmul.f32 %v974_v25, %v974_v25 }
 0x403   :  { %v979_v30 = vsub.f32 %v975_v26, %v977_v27 }
 0x404   :  { %v980_v31 = vsub.f32 %v976_v28, %v978_v29 }
 0x405   :  { %v981_v32 = vadd.f32 1e-05, %v979_v30 }
 0x406   :  { %v982_v33 = vadd.f32 1e-05, %v980_v31 }
 0x407   :  { %1590 = vrsqrt.f32 %v981_v32 }
 0x408   :  { %1592 = vrsqrt.f32 %v982_v33 }
 0x411   :  { %v1591_v35 = vpop.eup %1590 }
 0x412   :  { %v1593_v36 = vpop.eup %1592 }
 0x413   :  { %v987_v38 = vcombine.low %v1591_v35, %v1593_v36 }
 0x415   :  { %v994_v37 = vrot.slane %v987_v38, %v1862_v40 }
 0x417   :  { %v1001_v39 = vrot.slane %v994_v37, %v1862_v40 }
 0x419   :  { %v1003_v41 = vmul.f32 %v1386_v34, %v1001_v39 }
 0x41b   :  { %v1008_v42 = vrot.slane %v1003_v41, %v1869_v46  ;;  %v1012_v43 = vrot.slane %v1003_v41, %v1871_v47 }
 0x41d   :  { %v1015_v44 = vmul.f32 %v1008_v42, %v973_v23  ;;  %v1016_v45 = vmul.f32 %v1012_v43, %v974_v25  ;;  %v1037_v48 = vmul.f32 %v1012_v43, %v938_v63  ;;  %v1036_v49 = vmul.f32 %v1008_v42, %v936_v59 }
 0x41f   :  { %v1019_v50 = vcombine.low %v1015_v44, %v1016_v45 }
 0x421   :  { %v1026_v51 = vrot.slane %v1019_v50, %v1862_v40 }
 0x423   :  { %v1033_v53 = vrot.slane %v1026_v51, %v1862_v40  ;;  %v1388_v40 = vld [vmem:[%s1943_s6] ss:$0 sm:$0xff] }
 0x425   :  { %v1035_v54 = vsub.f32 %v1387_v52, %v1033_v53 }
 0x427   :  { %v1046_v55 = vrot.slane %v1035_v54, %v1871_v47  ;;  %v1042_v56 = vrot.slane %v1035_v54, %v1869_v46 }
 0x429   :  { %v1050_v57 = vadd.f32 %v1046_v55, %v1037_v48  ;;  %v1049_v60 = vadd.f32 %v1042_v56, %v1036_v49 }
 0x42b   :  { %v1052_v62 = vmax.f32 %v1050_v57, 0.0  ;;  %v1051_v0 = vmax.f32 %v1049_v60, 0.0 }
 0x42d   :  { %v1054_v63 = vpack.c.bf16 %v1052_v62, %v1052_v62  ;;  %v1053_v59 = vpack.c.bf16 %v1051_v0, %v1051_v0 }
 0x42f   :  { %1222 = vmatprep.mubr.bf16.mxu1 %v1054_v63 }
 0x430   :  { %1223 = vmatmul.mubr.bf16.vlgmr.msra.gmra.mrb[4].mxu1 %v1053_v59 }
 0x488   :  { %v99_v6 = vpop.xlane.xlu0 %98 }
 0x489   :  { %v100_v7 = vmax.f32 %v99_v6, 1e-24 }
 0x48b   :  { %1594 = vrsqrt.f32 %v100_v7 }
 0x495   :  { %v1595_v8 = vpop.eup %1594 }
 0x496   :  { %v102_v11 = vmul.f32 %v1595_v8, %v96_v1 }
 0x498   :  { %v103_v12 = vrot.slane %v102_v11, 4 }
 0x49a   :  { %v104_v13 = vadd.f32 %v103_v12, %v102_v11 }
 0x49c   :  { %v105_v16 = vrot.slane %v104_v13, 2 }
 0x49e   :  { %v106_v19 = vadd.f32 %v105_v16, %v104_v13 }
 0x4a0   :  { %v107_v22 = vrot.slane %v106_v19, 1 }
 0x4a2   :  { %v108_v25 = vadd.f32 %v107_v22, %v106_v19 }
 0x503   :  { %v1421_v3 = vpop.f32.mrb[4].mxu1 }
 0x504   :  { %v1422_v61 = vpop.f32.mrb[5].mxu1 }
 0x505   :  { %v1423_v47 = vadd.f32 %v1422_v61, %v1421_v3  ;;  %v1424_v58 = vpop.f32.mrb[6].mxu1 }
 0x506   :  { %v1425_v46 = vpop.f32.mrb[7].mxu1 }
 0x507   :  { %v1225_v4 = vadd.f32 %v1423_v47, %v1388_v40 }
 0x509   :  { %v1230_v5 = vmul.f32 %v1225_v4, %v1225_v4 }
 0x50b   :  { %1231 = vadd.xlane.f32.xlu1 %v1230_v5 }
 0x598   :  { %v1232_v9 = vpop.xlane.xlu1 %1231 }
 0x599   :  { %v1233_v10 = vmax.f32 %v1232_v9, 1e-24 }
 0x59b   :  { %1596 = vrsqrt.f32 %v1233_v10 }
 0x5a5   :  { %v1597_v14 = vpop.eup %1596 }
 0x5a6   :  { %v1235_v15 = vmul.f32 %v1597_v14, %v1225_v4 }
 0x5a8   :  { %v1236_v17 = vmul.f32 %v1235_v15, %v102_v11  ;;  %v1246_v18 = vrot.slane %v1235_v15, 4 }
 0x5aa   :  { %1237 = vadd.xlane.f32.xlu1 %v1236_v17  ;;  %v1247_v20 = vadd.f32 %v1246_v18, %v1235_v15 }
 0x5ac   :  { %v1248_v21 = vrot.slane %v1247_v20, 2 }
 0x5ae   :  { %v1249_v23 = vadd.f32 %v1248_v21, %v1247_v20 }
 0x5b0   :  { %v1250_v24 = vrot.slane %v1249_v23, 1 }
 0x5b2   :  { %v1251_v26 = vadd.f32 %v1250_v24, %v1249_v23 }
 0x5b4   :  { %v1252_v27 = vmul.f32 %v1251_v26, %v108_v25 }
 0x5b6   :  { %v1254_v28 = vsel %vm1253_vm0, %v1252_v27, 0.0 }
 0x5b7   :  { %1255 = vadd.xlane.f32.xlu0 %v1254_v28 }
 0x637   :  { %v1238_v29 = vpop.xlane.xlu1 %1237 }
 0x638   :  { %v1239_v30 = vrot.slane %v1238_v29, 4 }
 0x63a   :  { %v1240_v31 = vadd.f32 %v1239_v30, %v1238_v29 }
 0x63c   :  { %v1241_v32 = vrot.slane %v1240_v31, 2 }
 0x63e   :  { %v1242_v33 = vadd.f32 %v1241_v32, %v1240_v31 }
 0x640   :  { %v1243_v35 = vrot.slane %v1242_v33, 1 }
 0x642   :  { %v1244_v36 = vadd.f32 %v1243_v35, %v1242_v33 }
 0x644   :  { %1427 = vpush %v1244_v36  ;;  %v1256_v38 = vpop.xlane.xlu0 %1255 }
 0x645   :  { %v1257_v37 = vrot.slane %v1256_v38, 4 }
 0x647   :  { %v1258_v34 = vadd.f32 %v1257_v37, %v1256_v38 }
 0x649   :  { %v1259_v39 = vrot.slane %v1258_v34, 2 }
 0x64b   :  { %v1260_v41 = vadd.f32 %v1259_v39, %v1258_v34 }
 0x64d   :  { %v1261_v42 = vrot.slane %v1260_v41, 1 }
 0x64f   :  { %v1262_v43 = vadd.f32 %v1261_v42, %v1260_v41 }
 0x651   :  { %1429 = vpush %v1262_v43 }
 0x675   :  { %s1428_s6 = spop %1427 }
 0x676   :  { %s1267_s20 = smul.f32 0.125, %s1428_s6 }
 0x678   :  { %1269 = sst [smem:[#allocation11]] %s1267_s20 }
 0x679   :  { %1717 = shalt.err (!%p1714_p0)
}
 0x67a   :  { %s1749_s17 = smov [#allocation11]   ;;  %s1718_s21 = scalar_lea.hbm %s1945_s8, 16 }
 0x67b   :  { %1282 = dma.smem_to_hbm %s1749_s17, 16, %s1944_s7, [#allocation4]  }
 0x67c   :  { %p1719_p1 = scmp.ne.s32.totalorder %s1945_s8, %s1718_s21  ;;  %p1722_p2 = scmp.lt.u32.totalorder %s1718_s21, %s1945_s8 }
 0x67e   :  { %p1724_p3 = pnand %p1722_p2, %p1719_p1 }
 0x682   :  { %s1430_s28 = spop %1429 }
 0x683   :  { %s1264_s29 = ssub.f32 %s1430_s28, %s1428_s6 }
 0x685   :  { %s1272_s18 = smul.f32 0.017857144, %s1264_s29 }
 0x687   :  { %1274 = sst [smem:[#allocation12]] %s1272_s18 }
 0x688   :  { %1727 = shalt.err (!%p1724_p3)
}
 0x689   :  { %s1750_s26 = smov [#allocation12]  }
 0x68a   :  { %1290 = dma.smem_to_hbm %s1750_s26, 16, %s1945_s8, [#allocation13]  }
 0x68b   :  { %1734 = dma.done.wait [#allocation4], 16  }
 0x68c   :  { %1735 = vsyncadd [#allocation4], 4294967280 }
 0x68d   :  { %1736 = dma.done.wait [#allocation13], 16  }
 0x68e   :  { %1737 = vsyncadd [#allocation13], 4294967280 }
 0x68f   :  { %1297 = sfence }
 0x690   :  { %1298 = vsyncpa [#allocation3], 1 }
 0x691   :  { %1299 = vsyncpa [#allocation6], 1 }
 0x692   :  { %1300 = vsyncpa [#allocation9], 1 }
 0x693   :  { %1301 = vsyncpa [#allocation4], 1 }
 0x694   :  { %1302 = vsyncpa [#allocation13], 1 }

</bundles_post_ra>
